<compile_context>
chip_gen: v6e
topology: v6e:2x2x1
jax: 0.10.0
libtpu: 0.0.40
codegen_flags: <defaults>
</compile_context>

<pallas_src>
import functools

import jax
import jax.numpy as jnp
from jax.experimental import pallas as pl
from jax.experimental.pallas import tpu as pltpu


def _vmem_capacity_bytes():
    try:
        info = pltpu.get_tpu_info()
        cap = getattr(info, "vmem_capacity_bytes", None)
        if cap:
            return int(cap)
    except Exception:
        pass
    return 64 * 1024 * 1024  # conservative fallback (v7x-sized)


def _masked_nll_kernel(lp_ref, tgt_ref, mask_ref, sum_ref, cnt_ref,
                       acc_sum, acc_cnt, *, n_rows, row_tile, steps_per_core):
    c = pl.program_id(0)   # core-split axis ("parallel")
    j = pl.program_id(1)   # row-block axis ("arbitrary", accumulated)

    @pl.when(j == 0)
    def _():
        acc_sum[...] = jnp.zeros_like(acc_sum)
        acc_cnt[...] = jnp.zeros_like(acc_cnt)

    lp = lp_ref[...]        # (row_tile, V), native dtype
    tgt = tgt_ref[...]      # (row_tile, 1) int32
    m = mask_ref[...]       # (row_tile, 1) float32

    # Gather along the last dim via compare + select (pure VPU, no cross-lane gather).
    # Exactly one element per row survives, so the lane-reduce is exact even in bf16.
    vocab_ids = jax.lax.broadcasted_iota(jnp.int32, lp.shape, 1)
    sel = jnp.sum(jnp.where(vocab_ids == tgt, lp, jnp.zeros_like(lp)),
                  axis=-1, keepdims=True).astype(jnp.float32)      # (row_tile, 1)

    # Row-validity mask covers the ragged final block and any over-split logical blocks
    # (no pad copy of the (N, V) tensor). Use where (not multiply) so garbage / -inf in
    # invalid rows can never produce NaN.
    start = (c * steps_per_core + j) * row_tile
    row_ids = start + jax.lax.broadcasted_iota(jnp.int32, m.shape, 0)
    valid = (m != 0.0) & (row_ids < n_rows)

    acc_sum[...] += jnp.where(valid, sel, 0.0)
    acc_cnt[...] += valid.astype(jnp.float32)

    @pl.when(j == pl.num_programs(1) - 1)
    def _():
        sum_ref[...] = jnp.sum(acc_sum[...]).reshape(1, 1, 1)
        cnt_ref[...] = jnp.sum(acc_cnt[...]).reshape(1, 1, 1)


def masked_nll_loss(logprob, tgt, mask, *, row_tile=None, core_splits=2):
    """logprob: (N, V); tgt: (N, 1) int; mask: (N, 1) 0/1 -> scalar loss (f32).

    Note: if sum(mask) == 0 this returns NaN, matching torch.mean of an empty tensor.
    """
    N, V = logprob.shape
    tgt = tgt.reshape(N, 1).astype(jnp.int32)
    mask = mask.reshape(N, 1).astype(jnp.float32)

    itemsize = jnp.dtype(logprob.dtype).itemsize
    # Sublane alignment: 8 for 4-byte, 16 for 2-byte, 32 for 1-byte dtypes.
    align = max(8, 32 // max(1, itemsize))

    # VMEM budget (chip-aware): leave half of physical VMEM as scoped limit, and use
    # ~1/4 of that per logprob buffer (it is double-buffered by the pipeline).
    vmem_cap = _vmem_capacity_bytes()
    vmem_limit = int(min(vmem_cap // 2, 96 * 1024 * 1024))
    per_buffer = vmem_limit // 4

    # Tiny-N case: pad all three inputs up to one aligned tile (cheap: < align rows).
    pad = 0
    if N < align:
        pad = align - N
        logprob = jnp.pad(logprob, ((0, pad), (0, 0)))
        tgt = jnp.pad(tgt, ((0, pad), (0, 0)))
        mask = jnp.pad(mask, ((0, pad), (0, 0)))
    Np = N + pad
    max_tile = (Np // align) * align  # keep block <= array rows

    if row_tile is None:
        budget_rows = per_buffer // max(1, V * itemsize)
        row_tile = max(align, min((budget_rows // align) * align, 2048))
    row_tile = int(max(align, min((row_tile // align) * align, max_tile)))

    n_blocks = pl.cdiv(Np, row_tile)
    steps_per_core = pl.cdiv(n_blocks, core_splits)
    grid = (core_splits, steps_per_core)

    def row_block(c, j):
        # Clamp so the DMA never indexes past the last block; over-split logical
        # blocks contribute nothing thanks to the in-kernel row-validity mask.
        return jnp.minimum(c * steps_per_core + j, n_blocks - 1)

    kernel = functools.partial(
        _masked_nll_kernel,
        n_rows=N, row_tile=row_tile, steps_per_core=steps_per_core)

    sums, cnts = pl.pallas_call(
        kernel,
        out_shape=(
            jax.ShapeDtypeStruct((core_splits, 1, 1), jnp.float32),
            jax.ShapeDtypeStruct((core_splits, 1, 1), jnp.float32),
        ),
        grid_spec=pltpu.PrefetchScalarGridSpec(
            num_scalar_prefetch=0,
            grid=grid,
            in_specs=[
                pl.BlockSpec((row_tile, V), lambda c, j: (row_block(c, j), 0)),
                pl.BlockSpec((row_tile, 1), lambda c, j: (row_block(c, j), 0)),
                pl.BlockSpec((row_tile, 1), lambda c, j: (row_block(c, j), 0)),
            ],
            out_specs=[
                pl.BlockSpec((1, 1, 1), lambda c, j: (c, 0, 0)),
                pl.BlockSpec((1, 1, 1), lambda c, j: (c, 0, 0)),
            ],
            scratch_shapes=[
                pltpu.VMEM((row_tile, 1), jnp.float32),
                pltpu.VMEM((row_tile, 1), jnp.float32),
            ],
        ),
        compiler_params=pltpu.CompilerParams(
            dimension_semantics=("parallel", "arbitrary"),
            vmem_limit_bytes=vmem_limit,
        ),
        cost_estimate=pl.CostEstimate(
            flops=3 * N * V,
            transcendentals=0,
            bytes_accessed=N * V * itemsize + N * 8 + 8 * core_splits,
        ),
    )(logprob, tgt, mask)

    total = jnp.sum(sums)   # sum of per-core partial masked sums
    count = jnp.sum(cnts)   # sum of per-core mask counts
    return -(total / count)


def _reference(logprob, tgt, mask):
    sel = jnp.take_along_axis(logprob.astype(jnp.float32), tgt.astype(jnp.int32), axis=-1)
    m = mask.astype(jnp.float32)
    return -(jnp.sum(sel * m) / jnp.sum(m))


if __name__ == "__main__":
    key = jax.random.PRNGKey(0)

    def make_case(key, N, V):
        k1, k2, k3 = jax.random.split(key, 3)
        logits = jax.random.normal(k1, (N, V), dtype=jnp.float32)
        logprob = jax.nn.log_softmax(logits, axis=-1)
        tgt = jax.random.randint(k2, (N, 1), 0, V, dtype=jnp.int32)
        mask = (jax.random.uniform(k3, (N, 1)) > 0.3).astype(jnp.float32)
        return logprob, tgt, mask

    # Case 1: small, exact-tile shapes (the module's typical flattened batch*seq rows).
    k1, k2, k3 = jax.random.split(key, 3)
    lp_a, tgt_a, m_a = make_case(k1, 16, 32)
    loss_a = jax.block_until_ready(jax.jit(masked_nll_loss)(lp_a, tgt_a, m_a))
    assert jnp.allclose(loss_a, _reference(lp_a, tgt_a, m_a), atol=1e-5, rtol=1e-5)

    # Case 2: ragged row count (exercises the no-pad / edge-block validity mask).
    lp_b, tgt_b, m_b = make_case(k2, 37, 96)
    loss_b = jax.block_until_ready(jax.jit(masked_nll_loss)(lp_b, tgt_b, m_b))
    assert jnp.allclose(loss_b, _reference(lp_b, tgt_b, m_b), atol=1e-5, rtol=1e-5)

    # Case 3: multi-step accumulation + uneven 2-way core split (forced small tile).
    lp_c, tgt_c, m_c = make_case(k3, 200, 64)
    f_c = jax.jit(functools.partial(masked_nll_loss, row_tile=8))
    loss_c = jax.block_until_ready(f_c(lp_c, tgt_c, m_c))
    assert jnp.allclose(loss_c, _reference(lp_c, tgt_c, m_c), atol=1e-5, rtol=1e-5)

    print("KERNEL_OK")
</pallas_src>

<mosaic_0001>
module attributes {stable_mosaic.version = 11 : i64} {
  func.func @_masked_nll_kernel(%arg0: i32, %arg1: i32, %arg2: memref<16x32xf32, #tpu.memory_space<vmem>>, %arg3: memref<16x1xi32, #tpu.memory_space<vmem>>, %arg4: memref<16x1xf32, #tpu.memory_space<vmem>>, %arg5: memref<1x1x1xf32, #tpu.memory_space<vmem>>, %arg6: memref<1x1x1xf32, #tpu.memory_space<vmem>>, %arg7: memref<16x1xf32, #tpu.memory_space<vmem>>, %arg8: memref<16x1xf32, #tpu.memory_space<vmem>>) attributes {dimension_semantics = [#tpu.dimension_semantics<parallel>, #tpu.dimension_semantics<arbitrary>], iteration_bounds = array<i64: 2, 1>, scalar_prefetch = 0 : i64, scratch_operands = 2 : i64, tpu.core_type = #tpu.core_type<tc>, window_params = [{transform_indices = @transform_0, window_bounds = array<i64: 16, 32>}, {transform_indices = @transform_1, window_bounds = array<i64: 16, 1>}, {transform_indices = @transform_2, window_bounds = array<i64: 16, 1>}, {transform_indices = @transform_3, window_bounds = array<i64: 1, 1, 1>}, {transform_indices = @transform_4, window_bounds = array<i64: 1, 1, 1>}]} {
    %c0_i32 = arith.constant 0 : i32
    %0 = arith.cmpi eq, %arg1, %c0_i32 : i32
    %1 = arith.extui %0 : i1 to i32
    %c0_i32_0 = arith.constant 0 : i32
    %2 = arith.cmpi ne, %1, %c0_i32_0 : i32
    scf.if %2 {
      %cst_20 = arith.constant 0.000000e+00 : f32
      %37 = vector.broadcast %cst_20 : f32 to vector<16x1xf32>
      %c0_21 = arith.constant 0 : index
      %c0_22 = arith.constant 0 : index
      %38 = vector.load %arg7[%c0_21, %c0_22] : memref<16x1xf32, #tpu.memory_space<vmem>>, vector<16x1xf32>
      tpu.vector_store %arg7[%c0_21, %c0_22], %37 {strides = array<i32>} : memref<16x1xf32, #tpu.memory_space<vmem>>, vector<16x1xf32>,
      %cst_23 = arith.constant 0.000000e+00 : f32
      %39 = vector.broadcast %cst_23 : f32 to vector<16x1xf32>
      %c0_24 = arith.constant 0 : index
      %c0_25 = arith.constant 0 : index
      %40 = vector.load %arg8[%c0_24, %c0_25] : memref<16x1xf32, #tpu.memory_space<vmem>>, vector<16x1xf32>
      tpu.vector_store %arg8[%c0_24, %c0_25], %39 {strides = array<i32>} : memref<16x1xf32, #tpu.memory_space<vmem>>, vector<16x1xf32>,
    } else {
    }
    %c0 = arith.constant 0 : index
    %c0_1 = arith.constant 0 : index
    %3 = vector.load %arg2[%c0, %c0_1] : memref<16x32xf32, #tpu.memory_space<vmem>>, vector<16x32xf32>
    %c0_2 = arith.constant 0 : index
    %c0_3 = arith.constant 0 : index
    %4 = vector.load %arg3[%c0_2, %c0_3] : memref<16x1xi32, #tpu.memory_space<vmem>>, vector<16x1xi32>
    %c0_4 = arith.constant 0 : index
    %c0_5 = arith.constant 0 : index
    %5 = vector.load %arg4[%c0_4, %c0_5] : memref<16x1xf32, #tpu.memory_space<vmem>>, vector<16x1xf32>
    %6 = tpu.iota {dimensions = array<i32: 1>} : vector<16x32xi32>
    %7 = vector.broadcast %4 : vector<16x1xi32> to vector<16x32xi32>
    %8 = arith.cmpi eq, %6, %7 : vector<16x32xi32>
    %cst = arith.constant 0.000000e+00 : f32
    %9 = vector.broadcast %cst : f32 to vector<16x32xf32>
    %10 = arith.select %8, %3, %9 : vector<16x32xi1>, vector<16x32xf32>
    %cst_6 = arith.constant dense<0.000000e+00> : vector<16xf32>
    %11 = vector.multi_reduction <add>, %10, %cst_6 [1] : vector<16x32xf32> to vector<16xf32>
    %12 = vector.shape_cast %11 : vector<16xf32> to vector<16x1xf32>
    %c1_i32 = arith.constant 1 : i32
    %13 = arith.muli %arg0, %c1_i32 : i32
    %14 = arith.addi %13, %arg1 : i32
    %c16_i32 = arith.constant 16 : i32
    %15 = arith.muli %14, %c16_i32 : i32
    %16 = tpu.iota {dimensions = array<i32: 0>} : vector<16x1xi32>
    %17 = vector.broadcast %15 : i32 to vector<16x1xi32>
    %18 = arith.addi %17, %16 : vector<16x1xi32>
    %cst_7 = arith.constant 0.000000e+00 : f32
    %19 = vector.broadcast %cst_7 : f32 to vector<16x1xf32>
    %20 = arith.cmpf one, %5, %19 : vector<16x1xf32>
    %c16_i32_8 = arith.constant 16 : i32
    %21 = vector.broadcast %c16_i32_8 : i32 to vector<16x1xi32>
    %22 = arith.cmpi slt, %18, %21 : vector<16x1xi32>
    %23 = arith.andi %20, %22 : vector<16x1xi1>
    %c0_9 = arith.constant 0 : index
    %c0_10 = arith.constant 0 : index
    %24 = vector.load %arg7[%c0_9, %c0_10] : memref<16x1xf32, #tpu.memory_space<vmem>>, vector<16x1xf32>
    %cst_11 = arith.constant 0.000000e+00 : f32
    %25 = vector.broadcast %cst_11 : f32 to vector<16x1xf32>
    %26 = arith.select %23, %12, %25 : vector<16x1xi1>, vector<16x1xf32>
    %27 = arith.addf %24, %26 : vector<16x1xf32>
    %c0_12 = arith.constant 0 : index
    %c0_13 = arith.constant 0 : index
    %28 = vector.load %arg7[%c0_12, %c0_13] : memref<16x1xf32, #tpu.memory_space<vmem>>, vector<16x1xf32>
    tpu.vector_store %arg7[%c0_12, %c0_13], %27 {strides = array<i32>} : memref<16x1xf32, #tpu.memory_space<vmem>>, vector<16x1xf32>,
    %c0_14 = arith.constant 0 : index
    %c0_15 = arith.constant 0 : index
    %29 = vector.load %arg8[%c0_14, %c0_15] : memref<16x1xf32, #tpu.memory_space<vmem>>, vector<16x1xf32>
    %30 = arith.extui %23 : vector<16x1xi1> to vector<16x1xi32>
    %31 = arith.sitofp %30 : vector<16x1xi32> to vector<16x1xf32>
    %32 = arith.addf %29, %31 : vector<16x1xf32>
    %c0_16 = arith.constant 0 : index
    %c0_17 = arith.constant 0 : index
    %33 = vector.load %arg8[%c0_16, %c0_17] : memref<16x1xf32, #tpu.memory_space<vmem>>, vector<16x1xf32>
    tpu.vector_store %arg8[%c0_16, %c0_17], %32 {strides = array<i32>} : memref<16x1xf32, #tpu.memory_space<vmem>>, vector<16x1xf32>,
    %c0_i32_18 = arith.constant 0 : i32
    %34 = arith.cmpi eq, %arg1, %c0_i32_18 : i32
    %35 = arith.extui %34 : i1 to i32
    %c0_i32_19 = arith.constant 0 : i32
    %36 = arith.cmpi ne, %35, %c0_i32_19 : i32
    scf.if %36 {
      %c0_20 = arith.constant 0 : index
      %c0_21 = arith.constant 0 : index
      %37 = vector.load %arg7[%c0_20, %c0_21] : memref<16x1xf32, #tpu.memory_space<vmem>>, vector<16x1xf32>
      %38 = vector.shape_cast %37 : vector<16x1xf32> to vector<1x16x1xf32>
      %cst_22 = arith.constant dense<0.000000e+00> : vector<1xf32>
      %39 = vector.multi_reduction <add>, %38, %cst_22 [1, 2] : vector<1x16x1xf32> to vector<1xf32>
      %40 = vector.shape_cast %39 : vector<1xf32> to vector<1x1x1xf32>
      %41 = vector.extract %40[0, 0, 0] : f32 from vector<1x1x1xf32>
      %42 = vector.broadcast %41 : f32 to vector<1x1x1xf32>
      %c0_23 = arith.constant 0 : index
      %c0_24 = arith.constant 0 : index
      %c0_25 = arith.constant 0 : index
      %43 = vector.load %arg5[%c0_23, %c0_24, %c0_25] : memref<1x1x1xf32, #tpu.memory_space<vmem>>, vector<1x1x1xf32>
      tpu.vector_store %arg5[%c0_23, %c0_24, %c0_25], %42 {strides = array<i32>} : memref<1x1x1xf32, #tpu.memory_space<vmem>>, vector<1x1x1xf32>,
      %c0_26 = arith.constant 0 : index
      %c0_27 = arith.constant 0 : index
      %44 = vector.load %arg8[%c0_26, %c0_27] : memref<16x1xf32, #tpu.memory_space<vmem>>, vector<16x1xf32>
      %45 = vector.shape_cast %44 : vector<16x1xf32> to vector<1x16x1xf32>
      %cst_28 = arith.constant dense<0.000000e+00> : vector<1xf32>
      %46 = vector.multi_reduction <add>, %45, %cst_28 [1, 2] : vector<1x16x1xf32> to vector<1xf32>
      %47 = vector.shape_cast %46 : vector<1xf32> to vector<1x1x1xf32>
      %48 = vector.extract %47[0, 0, 0] : f32 from vector<1x1x1xf32>
      %49 = vector.broadcast %48 : f32 to vector<1x1x1xf32>
      %c0_29 = arith.constant 0 : index
      %c0_30 = arith.constant 0 : index
      %c0_31 = arith.constant 0 : index
      %50 = vector.load %arg6[%c0_29, %c0_30, %c0_31] : memref<1x1x1xf32, #tpu.memory_space<vmem>>, vector<1x1x1xf32>
      tpu.vector_store %arg6[%c0_29, %c0_30, %c0_31], %49 {strides = array<i32>} : memref<1x1x1xf32, #tpu.memory_space<vmem>>, vector<1x1x1xf32>,
    } else {
    }
    return
  }
  func.func @transform_0(%arg0: i32, %arg1: i32) -> (i32, i32) {
    %c1_i32 = arith.constant 1 : i32
    %0 = arith.muli %arg0, %c1_i32 : i32
    %1 = arith.addi %0, %arg1 : i32
    %c0_i32 = arith.constant 0 : i32
    %2 = arith.minsi %1, %c0_i32 : i32
    %c0_i32_0 = arith.constant 0 : i32
    %c0_i32_1 = arith.constant 0 : i32
    return %2, %c0_i32_0 : i32, i32
  }
  func.func @transform_1(%arg0: i32, %arg1: i32) -> (i32, i32) {
    %c1_i32 = arith.constant 1 : i32
    %0 = arith.muli %arg0, %c1_i32 : i32
    %1 = arith.addi %0, %arg1 : i32
    %c0_i32 = arith.constant 0 : i32
    %2 = arith.minsi %1, %c0_i32 : i32
    %c0_i32_0 = arith.constant 0 : i32
    %c0_i32_1 = arith.constant 0 : i32
    return %2, %c0_i32_0 : i32, i32
  }
  func.func @transform_2(%arg0: i32, %arg1: i32) -> (i32, i32) {
    %c1_i32 = arith.constant 1 : i32
    %0 = arith.muli %arg0, %c1_i32 : i32
    %1 = arith.addi %0, %arg1 : i32
    %c0_i32 = arith.constant 0 : i32
    %2 = arith.minsi %1, %c0_i32 : i32
    %c0_i32_0 = arith.constant 0 : i32
    %c0_i32_1 = arith.constant 0 : i32
    return %2, %c0_i32_0 : i32, i32
  }
  func.func @transform_3(%arg0: i32, %arg1: i32) -> (i32, i32, i32) {
    %c0_i32 = arith.constant 0 : i32
    %c0_i32_0 = arith.constant 0 : i32
    %c0_i32_1 = arith.constant 0 : i32
    return %arg0, %c0_i32, %c0_i32_0 : i32, i32, i32
  }
  func.func @transform_4(%arg0: i32, %arg1: i32) -> (i32, i32, i32) {
    %c0_i32 = arith.constant 0 : i32
    %c0_i32_0 = arith.constant 0 : i32
    %c0_i32_1 = arith.constant 0 : i32
    return %arg0, %c0_i32, %c0_i32_0 : i32, i32, i32
  }
}

</mosaic_0001>

<bundles_post_ra>
// kernel: masked_nll_loss.1
= control target key start
LH: loop header
LB: loop body
LE: loop exit
PB: predicated region body
PF: predicated region fallthrough
CT: control target
= control target key end

     0   :  { %s629_s15 = smov 0   ;;  %s631_s16 = smov 0   ;;  %s710_s0 = inlined_call_operand.vmem [shape: f32[16,32], index: 0, kind: input, shape index: {}]   ;;  %s711_s1 = inlined_call_operand.vmem [shape: s32[16,1], index: 1, kind: input, shape index: {}]   ;;  %s712_s2 = inlined_call_operand.vmem [shape: f32[16,1], index: 2, kind: input, shape index: {}]   ;;  %s713_s3 = inlined_call_operand.vmem [shape: f32[2,1,1], index: 3, kind: output, shape index: {0}]   ;;  %s714_s4 = inlined_call_operand.vmem [shape: f32[2,1,1], index: 4, kind: output, shape index: {1}]  }
   0x1   :  { %s633_s17 = smov 0  }
   0x2 LB: > { %s27_s18 = sadd.s32 1, %s596_s16  ;;  %p535_p0 = scmp.ge.s32.totalorder %s600_s17, 1  ;;  %s600_s17 = sphi %s633_s17, %s15_s17   ;;  %s596_s16 = sphi %s631_s16, %s720_s16   ;;  %s592_s15 = sphi %s629_s15, %s719_s15  }
   0x3   : > { %p29_p1 = scmp.ge.s32.totalorder %s27_s18, 2  ;;  %p236_p2 = scmp.lt.s32.totalorder %s600_s17, 3 }
   0x5   : > { %s722_s18 = smov (%p29_p1, %s27_s18), 0  ;;  %p237_p3 = pnand %p535_p0, %p236_p2 }
   0x6   : > { %p283_p4 = scmp.lt.s32.totalorder (!%p237_p3), %s592_s15, 0  ;;  %s542_s28 = sshll.u32 (!%p237_p3), %s592_s15, 4 }
   0x7   : > { %240 = sbr.rel (%p237_p3) target bundleno = 507 (0x1fb), region = 32  ;;  %p318_p6 = scmp.lt.s32.totalorder (!%p237_p3), %s592_s15, 1 }
   0xc   : > { %v602_v0 = vmov 0   ;;  %s284_s19 = scalar_select %p283_p4, %s592_s15, 0  ;;  %v339_v3 = vlaneseq  ;;  %vm328_vm0 = vcmask 7168   ;;  %v603_v5 = vmov 0.0  }
   0xd   : > { %577 = vset.pattern.permute.xlu0 %v602_v0  ;;  %329 = vst.msk [vmem:[#allocation2] sm:$0xff] %vm328_vm0, %v603_v5  ;;  %331 = vst.msk [vmem:[#allocation3] sm:$0xff] %vm328_vm0, %v603_v5  ;;  %v363_v7 = vstv %s542_s28  ;;  %vm351_vm4 = vcmask 261120   ;;  %s726_s15 = smov (!%p318_p6, %s592_s15), 1  ;;  %vm409_vm10 = vcmask 0  }
   0xe   : > { %s536_s20 = sshll.u32 %s284_s19, 1  ;;  %v361_v4 = vshrl.u32 %v339_v3, 7  ;;  %330 = vst.msk [vmem:[#allocation2 + $0x8] sm:$0xff] %vm328_vm0, %v603_v5  ;;  %332 = vst.msk [vmem:[#allocation3 + $0x8] sm:$0xff] %vm328_vm0, %v603_v5  ;;  %v340_v13 = vand.u32 127, %v339_v3  ;;  %s320_s8 = scalar_lea.vmem %s713_s3, %s726_s15 }
   0xf   : > { %p286_p5 = scmp.lt.s32.totalorder %s536_s20, 1  ;;  %s323_s12 = scalar_lea.vmem %s714_s4, %s726_s15 }
  0x10   : > { %v364_v8 = vadd.s32 %v363_v7, %v361_v4  ;;  %v362_v21 = vadd.s32 8, %v361_v4 }
  0x11   : > { %s724_s20 = smov (!%p286_p5, %s536_s20), 1 }
  0x12   : > { %s537_s21 = sshll.u32 %s724_s20, 3  ;;  %vm368_vm2 = vcmp.lt.s32.totalorder %v364_v8, 16  ;;  %v365_v23 = vadd.s32 %v363_v7, %v362_v21 }
  0x13   : > { %s301_s24 = scalar_lea.vmem %s711_s1, %s537_s21  ;;  %s657_s27 = scalar_lea.vmem %s712_s2, %s537_s21 }
  0x14   : > { %v335_v1 = vld [vmem:[%s301_s24] sm:$0xff]  ;;  %v336_v2 = vld [vmem:[%s301_s24 + $0x8] sm:$0xff]  ;;  %v381_v11 = vld [vmem:[#allocation3] sm:$0xff]  ;;  %s289_s5 = scalar_lea.vmem %s710_s0, %s537_s21  ;;  %vm369_vm8 = vcmp.lt.s32.totalorder %v365_v23, 16 }
  0x15   : > { %342 = vperm.xlu0 %577, %v335_v1   ;;  %v337_v6 = vld [vmem:[%s657_s27] sm:$0xff]  ;;  %v334_v18 = vld [vmem:[%s289_s5 + $0x8] sm:$0xff]  ;;  %v382_v26 = vld [vmem:[#allocation3 + $0x8] sm:$0xff] }
  0x16   : > { %vm366_vm1 = vcmp.ne.f32.partialorder %v337_v6, 0.0  ;;  %v333_v14 = vld [vmem:[%s289_s5] sm:$0xff]  ;;  %v338_v24 = vld [vmem:[%s657_s27 + $0x8] sm:$0xff] }
  0x17   : > { %vm665_vm3 = vmand %vm366_vm1, %vm368_vm2  ;;  %vm367_vm7 = vcmp.ne.f32.partialorder %v338_v24, 0.0  ;;  %v372_v34 = vld [vmem:[#allocation2] sm:$0xff]  ;;  %v373_v38 = vld [vmem:[#allocation2 + $0x8] sm:$0xff] }
  0x18   : > { %v543_v10 = vsel %vm665_vm3, 1.0, %v603_v5  ;;  %vm676_vm9 = vmand %vm367_vm7, %vm369_vm8 }
  0x19   : > { %345 = vperm.xlu0 %577, %v336_v2   ;;  %v387_v12 = vadd.f32 %v543_v10, %v381_v11  ;;  %v544_v27 = vsel %vm676_vm9, 1.0, %v603_v5 }
  0x1a   : > { %v388_v28 = vadd.f32 %v544_v27, %v382_v26 }
  0x1b   : > { %389 = vst.msk [vmem:[#allocation3] sm:$0xff] %vm328_vm0, %v387_v12 }
  0x1c   : > { %390 = vst.msk [vmem:[#allocation3 + $0x8] sm:$0xff] %vm328_vm0, %v388_v28 }
  0x22   : > { %v411_v29 = vld [vmem:[#allocation3] sm:$0xff] }
  0x23   : > { %v412_v30 = vld [vmem:[#allocation3 + $0x8] sm:$0xff]  ;;  %v413_v31 = vsel %vm328_vm0, %v411_v29, 0.0 }
  0x24   : > { %v414_v32 = vsel %vm328_vm0, %v412_v30, 0.0 }
  0x25   : > { %v415_v33 = vadd.f32 %v414_v32, %v413_v31 }
  0x90   : > { %v343_v15 = vpop.permute.xlu0 %342 }
  0x91   : > { %vm347_vm5 = vcmp.eq.s32.totalorder %v340_v13, %v343_v15 }
  0x92   : > { %v349_v16 = vsel %vm347_vm5, %v333_v14, 0.0 }
  0x93   : > { %v352_v17 = vsel %vm351_vm4, %v349_v16, 0.0 }
  0x94   : > { %v346_v19 = vpop.permute.xlu0 %345  ;;  %353 = vadd.xlane.f32.xlu1 %v352_v17 }
  0x95   : > { %vm348_vm6 = vcmp.eq.s32.totalorder %v340_v13, %v346_v19 }
  0x96   : > { %v350_v20 = vsel %vm348_vm6, %v334_v18, 0.0 }
  0x97   : > { %v355_v22 = vsel %vm351_vm4, %v350_v20, 0.0 }
  0x98   : > { %356 = vadd.xlane.f32.xlu1 %v355_v22 }
  0x9c   : > { %416 = vadd.xlane.f32.xlu1 %v415_v33 }
 0x11d   : > { %v354_v35 = vpop.xlane.xlu1 %353 }
 0x11e   : > { %v374_v36 = vsel %vm665_vm3, %v354_v35, 0.0 }
 0x11f   : > { %v376_v37 = vadd.f32 %v374_v36, %v372_v34 }
 0x121   : > { %379 = vst.msk [vmem:[#allocation2] sm:$0xff] %vm328_vm0, %v376_v37  ;;  %v357_v39 = vpop.xlane.xlu1 %356 }
 0x122   : > { %v375_v40 = vsel %vm676_vm9, %v357_v39, 0.0 }
 0x123   : > { %v377_v41 = vadd.f32 %v375_v40, %v373_v38 }
 0x125   : > { %380 = vst.msk [vmem:[#allocation2 + $0x8] sm:$0xff] %vm328_vm0, %v377_v41  ;;  %v417_v47 = vpop.xlane.xlu1 %416 }
 0x126   : > { %v418_v48 = vrot.slane %v417_v47, 4 }
 0x128   : > { %v394_v42 = vld [vmem:[#allocation2] sm:$0xff]  ;;  %v419_v49 = vadd.f32 %v418_v48, %v417_v47 }
 0x129   : > { %v396_v44 = vsel %vm328_vm0, %v394_v42, 0.0 }
 0x12a   : > { %v420_v50 = vrot.slane %v419_v49, 2 }
 0x12c   : > { %v395_v43 = vld [vmem:[#allocation2 + $0x8] sm:$0xff]  ;;  %v421_v54 = vadd.f32 %v420_v50, %v419_v49 }
 0x12d   : > { %v397_v45 = vsel %vm328_vm0, %v395_v43, 0.0 }
 0x12e   : > { %v398_v46 = vadd.f32 %v397_v45, %v396_v44  ;;  %v422_v57 = vrot.slane %v421_v54, 1 }
 0x130   : > { %399 = vadd.xlane.f32.xlu0 %v398_v46  ;;  %v423_v60 = vadd.f32 %v422_v57, %v421_v54 }
 0x1b9   : > { %v400_v51 = vpop.xlane.xlu0 %399 }
 0x1ba   : > { %v401_v52 = vrot.slane %v400_v51, 4 }
 0x1bc   : > { %v402_v53 = vadd.f32 %v401_v52, %v400_v51 }
 0x1be   : > { %v403_v55 = vrot.slane %v402_v53, 2 }
 0x1c0   : > { %v404_v56 = vadd.f32 %v403_v55, %v402_v53 }
 0x1c2   : > { %v405_v58 = vrot.slane %v404_v56, 1 }
 0x1c4   : > { %v406_v59 = vadd.f32 %v405_v58, %v404_v56 }
 0x1c6   : > { %547 = vpush %v406_v59 }
 0x1c7   : > { %549 = vpush %v423_v60 }
 0x1f7   : > { %s548_s9 = spop %547 }
 0x1f8   : > { %v408_v61 = vstv %s548_s9  ;;  %s550_s13 = spop %549 }
 0x1f9   : > { %410 = vst.msk [vmem:[%s320_s8] sm:$0x1] %vm409_vm10, %v408_v61  ;;  %v425_v62 = vstv %s550_s13 }
 0x1fa   : > { %426 = vst.msk [vmem:[%s323_s12] sm:$0x1] %vm409_vm10, %v425_v62 }
 0x1fb PF: > { %s15_s17 = sadd.s32 1, %s600_s17   ;;  %s719_s15 = smov %s596_s16 }
 0x1fc   : > { %p12_p7 = scmp.ge.s32.totalorder %s15_s17, 4   ;;  %s720_s16 = smov %s722_s18 }
 0x1fe   :  { %14 = sbr.rel (!%p12_p7) target bundleno = 2 (0x2), region = 88 }

</bundles_post_ra>
